<compile_context>
chip_gen: v5e
topology: v5e:2x2
jax: 0.10.0
libtpu: 0.0.40
codegen_flags: <defaults>
</compile_context>

<pallas_src>
import functools

import jax
import jax.numpy as jnp
from jax import lax
from jax.experimental import pallas as pl
from jax.experimental.pallas import tpu as pltpu


def _fused_kernel(x_ref, w1_ref, g_ref, b_ref, w2_ref, o_ref, h_ref, *, eps, inv_n):
    # ---- Stage 1 + BatchNorm: computed ONCE (grid step 0) into persistent scratch.
    @pl.when(pl.program_id(0) == 0)
    def _():
        xb = x_ref[...].astype(jnp.bfloat16)                 # (Cin, rows), cast in-kernel
        h = jnp.dot(w1_ref[...], xb,
                    preferred_element_type=jnp.float32)      # (Cmid, rows) f32
        # Train-mode BatchNorm over rows (= N*H*W), biased variance; affine folded
        # into a single scale/shift.
        mean = jnp.sum(h, axis=1, keepdims=True) * inv_n     # (Cmid, 1)
        diff = h - mean
        var = jnp.sum(diff * diff, axis=1, keepdims=True) * inv_n
        scale = g_ref[...] * lax.rsqrt(var + eps)             # (Cmid, 1)
        h_ref[...] = (diff * scale + b_ref[...]).astype(h_ref.dtype)

    # ---- Stage 2, every grid step: out_tile (tn, rows) = w2_tile @ hn
    o_ref[...] = jnp.dot(w2_ref[...], h_ref[...],
                         preferred_element_type=jnp.float32)


def prepare_params(scale_nc11, w1_oc, gamma, beta, w2_oc):
    """One-time parameter prep (outside the hot path).

    scale_nc11: (1, Cin, 1, 1)   channel scale (x665)
    w1_oc:      (Cmid, Cin)      PyTorch 1x1 conv weight, squeezed
    w2_oc:      (Cout, Cmid)     PyTorch 1x1 conv weight, squeezed
    gamma/beta: (Cmid,)          BatchNorm affine params
    """
    cin = w1_oc.shape[1]
    s_row = scale_nc11.reshape(1, cin).astype(jnp.float32)
    w1s = (w1_oc.astype(jnp.float32) * s_row).astype(jnp.bfloat16)   # (Cmid, Cin)
    w2b = w2_oc.astype(jnp.bfloat16)                                 # (Cout, Cmid)
    g_col = gamma.reshape(-1, 1).astype(jnp.float32)                 # (Cmid, 1)
    b_col = beta.reshape(-1, 1).astype(jnp.float32)                  # (Cmid, 1)
    return w1s, w2b, g_col, b_col


def _pick_cout_tile(cout):
    # A few grid steps with ~256-576-wide Cout tiles so Pallas can double-buffer
    # the w2 / output tiles; single block for small Cout.
    if cout % 8 != 0:
        return cout
    for d in (576, 512, 448, 384, 320, 256, 192, 128):
        if d < cout and cout % d == 0:
            return d
    return cout


def fused_mul_conv_bn_conv(x_nchw, w1s, w2b, g_col, b_col, eps=1e-3):
    """x_nchw: (N, Cin, H, W) f32; prepared params from prepare_params().
    Returns (N, Cout, H, W) f32."""
    n, cin, hh, ww = x_nchw.shape
    cmid = w1s.shape[0]
    cout = w2b.shape[0]
    rows = n * hh * ww

    # Channels-first flat layout (Cin, rows).  For N == 1 (the module's case) this
    # is a free reshape -- no XLA transpose / extra HBM round trip.
    if n == 1:
        x_cr = x_nchw.reshape(cin, rows)
    else:
        x_cr = jnp.transpose(x_nchw, (1, 0, 2, 3)).reshape(cin, rows)

    tn = _pick_cout_tile(cout)
    grid = (cout // tn,)

    kernel = functools.partial(_fused_kernel, eps=float(eps),
                               inv_n=1.0 / float(rows))

    out2d = pl.pallas_call(
        kernel,
        out_shape=jax.ShapeDtypeStruct((cout, rows), jnp.float32),
        grid=grid,
        in_specs=[
            pl.BlockSpec((cin, rows), lambda j: (0, 0)),   # x     (resident, DMA'd once)
            pl.BlockSpec((cmid, cin), lambda j: (0, 0)),   # w1s   (resident)
            pl.BlockSpec((cmid, 1), lambda j: (0, 0)),     # gamma (column)
            pl.BlockSpec((cmid, 1), lambda j: (0, 0)),     # beta  (column)
            pl.BlockSpec((tn, cmid), lambda j: (j, 0)),    # w2 tile (pipelined)
        ],
        out_specs=pl.BlockSpec((tn, rows), lambda j: (j, 0)),
        scratch_shapes=[pltpu.VMEM((cmid, rows), jnp.bfloat16)],   # hn, persists over grid
        compiler_params=pltpu.CompilerParams(
            dimension_semantics=("arbitrary",),
            vmem_limit_bytes=24 * 1024 * 1024),
    )(x_cr, w1s, g_col, b_col, w2b)

    # (Cout, rows) -> NCHW.  For N == 1 this is again a free reshape.
    if n == 1:
        return out2d.reshape(1, cout, hh, ww)
    return jnp.transpose(out2d.reshape(cout, n, hh, ww), (1, 0, 2, 3))


def _reference(x660, x665, w1_oc, gamma, beta, w2_oc, eps=1e-3):
    y = x665 * x660                                              # broadcast mul
    h = jnp.einsum('nchw,oc->nohw', y, w1_oc)                    # 1x1 conv
    mean = jnp.mean(h, axis=(0, 2, 3), keepdims=True)
    var = jnp.var(h, axis=(0, 2, 3), keepdims=True)              # biased
    hn = (h - mean) / jnp.sqrt(var + eps)
    hn = hn * gamma.reshape(1, -1, 1, 1) + beta.reshape(1, -1, 1, 1)
    return jnp.einsum('nchw,oc->nohw', hn, w2_oc)                # 1x1 conv


if __name__ == "__main__":
    # Small shapes consistent with the module
    # (original: N=1, Cin=2064, Cmid=576, Cout=3456, H=W=7).
    N, CIN, H, W = 1, 256, 7, 7
    CMID, COUT = 128, 512
    EPS = 1e-3

    key = jax.random.PRNGKey(0)
    k0, k1, k2, k3 = jax.random.split(key, 4)

    x660 = jax.random.normal(k0, (N, CIN, H, W), dtype=jnp.float32)
    x665 = jax.random.normal(k1, (1, CIN, 1, 1), dtype=jnp.float32)
    # PyTorch conv weights (Cout, Cin, 1, 1) -> squeezed to (Cout, Cin)
    w1_oc = jax.random.normal(k2, (CMID, CIN), dtype=jnp.float32) * 0.02
    w2_oc = jax.random.normal(k3, (COUT, CMID), dtype=jnp.float32) * 0.02
    # BatchNorm affine params (PyTorch default init)
    gamma = jnp.ones((CMID,), dtype=jnp.float32)
    beta = jnp.zeros((CMID,), dtype=jnp.float32)

    # One-time weight prep (fold channel scale, cast to bf16).
    w1s, w2b, g_col, b_col = prepare_params(x665, w1_oc, gamma, beta, w2_oc)

    out = fused_mul_conv_bn_conv(x660, w1s, w2b, g_col, b_col, EPS)
    out = jax.block_until_ready(out)

    ref = _reference(x660, x665, w1_oc, gamma, beta, w2_oc, EPS)
    assert out.shape == (N, COUT, H, W), out.shape
    # bf16 weights/activations through two matmuls -> loosened tolerance.
    assert jnp.allclose(out, ref, rtol=2e-2, atol=2e-2), (
        float(jnp.max(jnp.abs(out - ref))))

    print("KERNEL_OK")
</pallas_src>

<mosaic_0001>
module attributes {stable_mosaic.version = 11 : i64} {
  func.func @_fused_kernel(%arg0: i32, %arg1: memref<256x49xf32, #tpu.memory_space<vmem>>, %arg2: memref<128x256xbf16, #tpu.memory_space<vmem>>, %arg3: memref<128x1xf32, #tpu.memory_space<vmem>>, %arg4: memref<128x1xf32, #tpu.memory_space<vmem>>, %arg5: memref<256x128xbf16, #tpu.memory_space<vmem>>, %arg6: memref<256x49xf32, #tpu.memory_space<vmem>>, %arg7: memref<128x49xbf16, #tpu.memory_space<vmem>>) attributes {dimension_semantics = [#tpu.dimension_semantics<arbitrary>], iteration_bounds = array<i64: 2>, scalar_prefetch = 0 : i64, scratch_operands = 1 : i64, tpu.core_type = #tpu.core_type<tc>, window_params = [{pipeline_mode = #tpu.pipeline_mode<synchronous>, transform_indices = @transform_0, window_bounds = array<i64: 256, 49>}, {pipeline_mode = #tpu.pipeline_mode<synchronous>, transform_indices = @transform_1, window_bounds = array<i64: 128, 256>}, {pipeline_mode = #tpu.pipeline_mode<synchronous>, transform_indices = @transform_2, window_bounds = array<i64: 128, 1>}, {pipeline_mode = #tpu.pipeline_mode<synchronous>, transform_indices = @transform_3, window_bounds = array<i64: 128, 1>}, {transform_indices = @transform_4, window_bounds = array<i64: 256, 128>}, {transform_indices = @transform_5, window_bounds = array<i64: 256, 49>}]} {
    %c0_i32 = arith.constant 0 : i32
    %0 = arith.cmpi eq, %arg0, %c0_i32 : i32
    %1 = arith.extui %0 : i1 to i32
    %c0_i32_0 = arith.constant 0 : i32
    %2 = arith.cmpi ne, %1, %c0_i32_0 : i32
    scf.if %2 {
      %c0_6 = arith.constant 0 : index
      %c0_7 = arith.constant 0 : index
      %7 = vector.load %arg1[%c0_6, %c0_7] : memref<256x49xf32, #tpu.memory_space<vmem>>, vector<256x49xf32>
      %8 = arith.truncf %7 : vector<256x49xf32> to vector<256x49xbf16>
      %c0_8 = arith.constant 0 : index
      %c0_9 = arith.constant 0 : index
      %9 = vector.load %arg2[%c0_8, %c0_9] : memref<128x256xbf16, #tpu.memory_space<vmem>>, vector<128x256xbf16>
      %cst_10 = arith.constant dense<0.000000e+00> : vector<128x49xf32>
      %10 = tpu.matmul %9, %8, %cst_10 {dimension_numbers = #tpu.dot_dimension_numbers<[1], [0], [0], [1], [0, 0, 1, 1], [], []>} : vector<128x256xbf16>, vector<256x49xbf16>, vector<128x49xf32> -> vector<128x49xf32>
      %cst_11 = arith.constant dense<0.000000e+00> : vector<128xf32>
      %11 = vector.multi_reduction <add>, %10, %cst_11 [1] : vector<128x49xf32> to vector<128xf32>
      %12 = vector.shape_cast %11 : vector<128xf32> to vector<128x1xf32>
      %cst_12 = arith.constant 0.0204081628 : f32
      %13 = vector.broadcast %cst_12 : f32 to vector<128x1xf32>
      %14 = arith.mulf %12, %13 : vector<128x1xf32>
      %15 = vector.broadcast %14 : vector<128x1xf32> to vector<128x49xf32>
      %16 = arith.subf %10, %15 : vector<128x49xf32>
      %17 = arith.mulf %16, %16 : vector<128x49xf32>
      %cst_13 = arith.constant dense<0.000000e+00> : vector<128xf32>
      %18 = vector.multi_reduction <add>, %17, %cst_13 [1] : vector<128x49xf32> to vector<128xf32>
      %19 = vector.shape_cast %18 : vector<128xf32> to vector<128x1xf32>
      %cst_14 = arith.constant 0.0204081628 : f32
      %20 = vector.broadcast %cst_14 : f32 to vector<128x1xf32>
      %21 = arith.mulf %19, %20 : vector<128x1xf32>
      %c0_15 = arith.constant 0 : index
      %c0_16 = arith.constant 0 : index
      %22 = vector.load %arg3[%c0_15, %c0_16] : memref<128x1xf32, #tpu.memory_space<vmem>>, vector<128x1xf32>
      %cst_17 = arith.constant 1.000000e-03 : f32
      %23 = vector.broadcast %cst_17 : f32 to vector<128x1xf32>
      %24 = arith.addf %21, %23 : vector<128x1xf32>
      %25 = math.rsqrt %24 : vector<128x1xf32>
      %26 = arith.mulf %22, %25 : vector<128x1xf32>
      %27 = vector.broadcast %26 : vector<128x1xf32> to vector<128x49xf32>
      %28 = arith.mulf %16, %27 : vector<128x49xf32>
      %c0_18 = arith.constant 0 : index
      %c0_19 = arith.constant 0 : index
      %29 = vector.load %arg4[%c0_18, %c0_19] : memref<128x1xf32, #tpu.memory_space<vmem>>, vector<128x1xf32>
      %30 = vector.broadcast %29 : vector<128x1xf32> to vector<128x49xf32>
      %31 = arith.addf %28, %30 : vector<128x49xf32>
      %32 = arith.truncf %31 : vector<128x49xf32> to vector<128x49xbf16>
      %c0_20 = arith.constant 0 : index
      %c0_21 = arith.constant 0 : index
      %33 = vector.load %arg7[%c0_20, %c0_21] : memref<128x49xbf16, #tpu.memory_space<vmem>>, vector<128x49xbf16>
      tpu.vector_store %arg7[%c0_20, %c0_21], %32 {strides = array<i32>} : memref<128x49xbf16, #tpu.memory_space<vmem>>, vector<128x49xbf16>,
    } else {
    }
    %c0 = arith.constant 0 : index
    %c0_1 = arith.constant 0 : index
    %3 = vector.load %arg5[%c0, %c0_1] : memref<256x128xbf16, #tpu.memory_space<vmem>>, vector<256x128xbf16>
    %c0_2 = arith.constant 0 : index
    %c0_3 = arith.constant 0 : index
    %4 = vector.load %arg7[%c0_2, %c0_3] : memref<128x49xbf16, #tpu.memory_space<vmem>>, vector<128x49xbf16>
    %cst = arith.constant dense<0.000000e+00> : vector<256x49xf32>
    %5 = tpu.matmul %3, %4, %cst {dimension_numbers = #tpu.dot_dimension_numbers<[1], [0], [0], [1], [0, 0, 1, 1], [], []>} : vector<256x128xbf16>, vector<128x49xbf16>, vector<256x49xf32> -> vector<256x49xf32>
    %c0_4 = arith.constant 0 : index
    %c0_5 = arith.constant 0 : index
    %6 = vector.load %arg6[%c0_4, %c0_5] : memref<256x49xf32, #tpu.memory_space<vmem>>, vector<256x49xf32>
    tpu.vector_store %arg6[%c0_4, %c0_5], %5 {strides = array<i32>} : memref<256x49xf32, #tpu.memory_space<vmem>>, vector<256x49xf32>,
    return
  }
  func.func @transform_0(%arg0: i32) -> (i32, i32) {
    %c0_i32 = arith.constant 0 : i32
    %c0_i32_0 = arith.constant 0 : i32
    %c0_i32_1 = arith.constant 0 : i32
    return %c0_i32, %c0_i32_0 : i32, i32
  }
  func.func @transform_1(%arg0: i32) -> (i32, i32) {
    %c0_i32 = arith.constant 0 : i32
    %c0_i32_0 = arith.constant 0 : i32
    %c0_i32_1 = arith.constant 0 : i32
    return %c0_i32, %c0_i32_0 : i32, i32
  }
  func.func @transform_2(%arg0: i32) -> (i32, i32) {
    %c0_i32 = arith.constant 0 : i32
    %c0_i32_0 = arith.constant 0 : i32
    %c0_i32_1 = arith.constant 0 : i32
    return %c0_i32, %c0_i32_0 : i32, i32
  }
  func.func @transform_3(%arg0: i32) -> (i32, i32) {
    %c0_i32 = arith.constant 0 : i32
    %c0_i32_0 = arith.constant 0 : i32
    %c0_i32_1 = arith.constant 0 : i32
    return %c0_i32, %c0_i32_0 : i32, i32
  }
  func.func @transform_4(%arg0: i32) -> (i32, i32) {
    %c0_i32 = arith.constant 0 : i32
    %c0_i32_0 = arith.constant 0 : i32
    return %arg0, %c0_i32 : i32, i32
  }
  func.func @transform_5(%arg0: i32) -> (i32, i32) {
    %c0_i32 = arith.constant 0 : i32
    %c0_i32_0 = arith.constant 0 : i32
    return %arg0, %c0_i32 : i32, i32
  }
}

</mosaic_0001>

<bundles_post_ra>
// kernel: tpu_custom_call.1
= control target key start
LH: loop header
LB: loop body
LE: loop exit
PB: predicated region body
PF: predicated region fallthrough
CT: control target
= control target key end

     0   :  { %s1789_s18 = smov 0   ;;  %s2531_s0 = inlined_call_operand.vmem [shape: f32[256,49], index: 0, kind: input, shape index: {}]   ;;  %s2532_s1 = inlined_call_operand.vmem [shape: bf16[128,256], index: 1, kind: input, shape index: {}]   ;;  %s2533_s2 = inlined_call_operand.vmem [shape: f32[128,1], index: 2, kind: input, shape index: {}]   ;;  %s2534_s3 = inlined_call_operand.vmem [shape: f32[128,1], index: 3, kind: input, shape index: {}]   ;;  %s2535_s4 = inlined_call_operand.vmem [shape: bf16[512,128], index: 4, kind: input, shape index: {}]   ;;  %s2536_s5 = inlined_call_operand.vmem [shape: f32[512,49], index: 5, kind: output, shape index: {}]  }
   0x1 LB: > { %s1454_s19 = sadd.s32 4294967295, %s1756_s18   ;;  %p1458_p0 = scmp.ge.s32.totalorder %s1756_s18, 1  ;;  %s1756_s18 = sphi %s1789_s18, %s15_s18  }
   0x2   : > { %p188_p1 = scmp.lt.s32.totalorder %s1756_s18, 3 }
   0x4   : > { %p189_p2 = pnand %p1458_p0, %p188_p1 }
   0x5   : > { %s1459_s20 = sshll.u32 (!%p189_p2), %s1454_s19, 5  ;;  %p1463_p4 = scmp.ne.s32.totalorder (!%p189_p2), %s1454_s19, 0 }
   0x6   : > { %192 = sbr.rel (%p189_p2) target bundleno = 863 (0x35f), region = 40  ;;  %p217_p3 = scmp.lt.s32.totalorder (!%p189_p2), %s1459_s20, 63 }
   0xb   : > { %s2546_s20 = smov (!%p217_p3, %s1459_s20), 63  ;;  %231 = sbr.rel (%p1463_p4) target bundleno = 634 (0x27a), region = 44 }
   0xc   : > { %s1460_s21 = sshll.u32 %s2546_s20, 2  ;;  %s1462_s22 = sshll.u32 %s2546_s20, 3 }
   0xd   : > { %s1800_s25 = scalar_lea.vmem %s2535_s4, %s1460_s21  ;;  %s1805_s28 = scalar_lea.vmem %s2536_s5, %s1462_s22 }
  0x10   : > { %v246_v0 = vld [vmem:[%s2531_s0 + $0x70] sm:$0xff]  ;;  %v247_v1 = vld [vmem:[%s2531_s0 + $0x78] sm:$0xff]  ;;  %v244_v5 = vld [vmem:[%s2531_s0 + $0x60] sm:$0xff]  ;;  %vm474_vm0 = vcmask 400384  }
  0x11   : > { %v262_v2 = vld [vmem:[%s2531_s0 + $0xf0] sm:$0xff]  ;;  %v271_v3 = vpack.c.bf16 %v247_v1, %v246_v0  ;;  %v263_v4 = vld [vmem:[%s2531_s0 + $0xf8] sm:$0xff]  ;;  %v245_v6 = vld [vmem:[%s2531_s0 + $0x68] sm:$0xff] }
  0x12   : > { %v279_v7 = vpack.c.bf16 %v263_v4, %v262_v2  ;;  %v260_v8 = vld [vmem:[%s2531_s0 + $0xe0] sm:$0xff]  ;;  %v261_v9 = vld [vmem:[%s2531_s0 + $0xe8] sm:$0xff]  ;;  %v270_v10 = vpack.c.bf16 %v245_v6, %v244_v5  ;;  %v242_v12 = vld [vmem:[%s2531_s0 + $0x50] sm:$0xff] }
  0x13   : > { %376 = vmatpush.bf16.msra.mxu0 %v271_v3  ;;  %1666 = vmatpush.bf16.msra.mxu2 %v271_v3  ;;  %v278_v11 = vpack.c.bf16 %v261_v9, %v260_v8  ;;  %v243_v13 = vld [vmem:[%s2531_s0 + $0x58] sm:$0xff]  ;;  %v258_v14 = vld [vmem:[%s2531_s0 + $0xd0] sm:$0xff]  ;;  %v240_v18 = vld [vmem:[%s2531_s0 + $0x40] sm:$0xff] }
  0x14   : > { %425 = vmatpush.bf16.msra.mxu1 %v279_v7  ;;  %1674 = vmatpush.bf16.msra.mxu3 %v279_v7  ;;  %v259_v15 = vld [vmem:[%s2531_s0 + $0xd8] sm:$0xff]  ;;  %v269_v16 = vpack.c.bf16 %v243_v13, %v242_v12  ;;  %v241_v19 = vld [vmem:[%s2531_s0 + $0x48] sm:$0xff]  ;;  %v256_v20 = vld [vmem:[%s2531_s0 + $0xc0] sm:$0xff] }
  0x15   : > { %v277_v17 = vpack.c.bf16 %v259_v15, %v258_v14  ;;  %v257_v21 = vld [vmem:[%s2531_s0 + $0xc8] sm:$0xff]  ;;  %v268_v22 = vpack.c.bf16 %v241_v19, %v240_v18  ;;  %v238_v24 = vld [vmem:[%s2531_s0 + $0x30] sm:$0xff]  ;;  %v239_v25 = vld [vmem:[%s2531_s0 + $0x38] sm:$0xff] }
  0x16   : > { %v276_v23 = vpack.c.bf16 %v257_v21, %v256_v20  ;;  %v254_v26 = vld [vmem:[%s2531_s0 + $0xb0] sm:$0xff]  ;;  %v255_v27 = vld [vmem:[%s2531_s0 + $0xb8] sm:$0xff]  ;;  %v267_v28 = vpack.c.bf16 %v239_v25, %v238_v24  ;;  %v236_v30 = vld [vmem:[%s2531_s0 + $0x20] sm:$0xff] }
  0x17   : > { %377 = vmatpush.bf16.msra.mxu0 %v270_v10  ;;  %1667 = vmatpush.bf16.msra.mxu2 %v270_v10  ;;  %v275_v29 = vpack.c.bf16 %v255_v27, %v254_v26  ;;  %v237_v31 = vld [vmem:[%s2531_s0 + $0x28] sm:$0xff]  ;;  %v252_v32 = vld [vmem:[%s2531_s0 + $0xa0] sm:$0xff]  ;;  %v234_v36 = vld [vmem:[%s2531_s0 + $0x10] sm:$0xff]  ;;  %v1758_v10 = vmov 0  }
  0x18   : > { %426 = vmatpush.bf16.msra.mxu1 %v278_v11  ;;  %1675 = vmatpush.bf16.msra.mxu3 %v278_v11  ;;  %v253_v33 = vld [vmem:[%s2531_s0 + $0xa8] sm:$0xff]  ;;  %v266_v34 = vpack.c.bf16 %v237_v31, %v236_v30  ;;  %v235_v37 = vld [vmem:[%s2531_s0 + $0x18] sm:$0xff]  ;;  %v250_v38 = vld [vmem:[%s2531_s0 + $0x90] sm:$0xff] }
  0x19   : > { %v274_v35 = vpack.c.bf16 %v253_v33, %v252_v32  ;;  %v251_v39 = vld [vmem:[%s2531_s0 + $0x98] sm:$0xff]  ;;  %v265_v40 = vpack.c.bf16 %v235_v37, %v234_v36  ;;  %v232_v42 = vld [vmem:[%s2531_s0] sm:$0xff]  ;;  %v233_v43 = vld [vmem:[%s2531_s0 + $0x8] sm:$0xff]  ;;  %1715 = vset.pattern.permute.xlu1 %v1758_v10  ;;  %1716 = vset.pattern.permute.xlu0 %v1758_v10 }
  0x1a   : > { %v273_v41 = vpack.c.bf16 %v251_v39, %v250_v38  ;;  %v248_v44 = vld [vmem:[%s2531_s0 + $0x80] sm:$0xff]  ;;  %v249_v45 = vld [vmem:[%s2531_s0 + $0x88] sm:$0xff]  ;;  %v264_v48 = vpack.c.bf16 %v233_v43, %v232_v42  ;;  %v1474_v60 = vld [vmem:[%s2532_s1 + $0x10] sm:$0xf]  ;;  %1717 = vset.pattern.permute.xlu2 %v1758_v10 }
  0x1b   : > { %378 = vmatpush.bf16.msra.mxu0 %v269_v16  ;;  %1668 = vmatpush.bf16.msra.mxu2 %v269_v16  ;;  %v1466_v46 = vld [vmem:[%s2532_s1] sm:$0xf]  ;;  %v1627_v47 = vld [vmem:[%s2532_s1 + $0x4] sm:$0xf0]  ;;  %v1626_v51 = vld [vmem:[%s2532_s1 + $0x4] sm:$0xf]  ;;  %v272_v52 = vpack.c.bf16 %v249_v45, %v248_v44 }
  0x1c   : > { %427 = vmatpush.bf16.msra.mxu1 %v277_v17  ;;  %1676 = vmatpush.bf16.msra.mxu3 %v277_v17  ;;  %v1498_v49 = vld [vmem:[%s2532_s1 + $0x40] sm:$0xf]  ;;  %v1635_v50 = vld [vmem:[%s2532_s1 + $0x44] sm:$0xf0]  ;;  %v1468_v53 = vld [vmem:[%s2532_s1 + $0x8] sm:$0xf0]  ;;  %v1467_v56 = vor.u32 %v1627_v47, %v1466_v46 }
  0x1d   : > { %v1634_v54 = vld [vmem:[%s2532_s1 + $0x44] sm:$0xf]  ;;  %v1500_v55 = vld [vmem:[%s2532_s1 + $0x48] sm:$0xf0]  ;;  %v1499_v57 = vor.u32 %v1635_v50, %v1498_v49  ;;  %v1471_v58 = vor.u32 %v1626_v51, %v1468_v53  ;;  %v1629_v61 = vld [vmem:[%s2532_s1 + $0x14] sm:$0xf0] }
  0x1e   : > { %v1503_v59 = vor.u32 %v1634_v54, %v1500_v55  ;;  %v1506_v62 = vld [vmem:[%s2532_s1 + $0x50] sm:$0xf]  ;;  %v1637_v63 = vld [vmem:[%s2532_s1 + $0x54] sm:$0xf0]  ;;  %v1628_v0 = vld [vmem:[%s2532_s1 + $0x14] sm:$0xf]  ;;  %v1475_v4 = vor.u32 %v1629_v61, %v1474_v60 }
  0x1f   : > { %379 = vmatpush.bf16.msra.mxu0 %v268_v22  ;;  %1669 = vmatpush.bf16.msra.mxu2 %v268_v22  ;;  %v1476_v1 = vld [vmem:[%s2532_s1 + $0x18] sm:$0xf0]  ;;  %v1636_v2 = vld [vmem:[%s2532_s1 + $0x54] sm:$0xf]  ;;  %v1507_v5 = vor.u32 %v1637_v63, %v1506_v62  ;;  %v939_v8 = vld [vmem:[%s2534_s3] sm:$0xff] }
  0x20   : > { %428 = vmatpush.bf16.msra.mxu1 %v276_v23  ;;  %1677 = vmatpush.bf16.msra.mxu3 %v276_v23  ;;  %v1508_v3 = vld [vmem:[%s2532_s1 + $0x58] sm:$0xf0]  ;;  %v1479_v6 = vor.u32 %v1628_v0, %v1476_v1  ;;  %v940_v9 = vld [vmem:[%s2534_s3 + $0x8] sm:$0xff]  ;;  %v941_v11 = vld [vmem:[%s2534_s3 + $0x10] sm:$0xff] }
  0x21   : > { %v1511_v7 = vor.u32 %v1636_v2, %v1508_v3  ;;  %957 = vperm.xlu1 %1715, %v939_v8   ;;  %962 = vperm.xlu0 %1716, %v940_v9   ;;  %v1482_v12 = vld [vmem:[%s2532_s1 + $0x20] sm:$0xf]  ;;  %v1631_v13 = vld [vmem:[%s2532_s1 + $0x24] sm:$0xf0]  ;;  %v942_v16 = vld [vmem:[%s2534_s3 + $0x18] sm:$0xff] }
  0x22   : > { %967 = vperm.xlu2 %1717, %v941_v11   ;;  %v1514_v14 = vld [vmem:[%s2532_s1 + $0x60] sm:$0xf]  ;;  %v1639_v15 = vld [vmem:[%s2532_s1 + $0x64] sm:$0xf0]  ;;  %v1630_v17 = vld [vmem:[%s2532_s1 + $0x24] sm:$0xf]  ;;  %v1483_v23 = vor.u32 %v1631_v13, %v1482_v12 }
  0x23   : > { %380 = vmatpush.bf16.msra.mxu0 %v267_v28  ;;  %1670 = vmatpush.bf16.msra.mxu2 %v267_v28  ;;  %v943_v18 = vld [vmem:[%s2534_s3 + $0x20] sm:$0xff]  ;;  %v944_v19 = vld [vmem:[%s2534_s3 + $0x28] sm:$0xff]  ;;  %v1515_v24 = vor.u32 %v1639_v15, %v1514_v14  ;;  %v945_v27 = vld [vmem:[%s2534_s3 + $0x30] sm:$0xff] }
  0x24   : > { %429 = vmatpush.bf16.msra.mxu1 %v275_v29  ;;  %1678 = vmatpush.bf16.msra.mxu3 %v275_v29  ;;  %v1484_v20 = vld [vmem:[%s2532_s1 + $0x28] sm:$0xf0]  ;;  %v1638_v21 = vld [vmem:[%s2532_s1 + $0x64] sm:$0xf]  ;;  %v946_v28 = vld [vmem:[%s2534_s3 + $0x38] sm:$0xff] }
  0x25   : > { %v1516_v22 = vld [vmem:[%s2532_s1 + $0x68] sm:$0xf0]  ;;  %v1487_v25 = vor.u32 %v1630_v17, %v1484_v20  ;;  %v947_v29 = vld [vmem:[%s2534_s3 + $0x40] sm:$0xff]  ;;  %v1490_v30 = vld [vmem:[%s2532_s1 + $0x30] sm:$0xf] }
  0x26   : > { %v1519_v26 = vor.u32 %v1638_v21, %v1516_v22  ;;  %v1633_v31 = vld [vmem:[%s2532_s1 + $0x34] sm:$0xf0]  ;;  %v1522_v32 = vld [vmem:[%s2532_s1 + $0x70] sm:$0xf]  ;;  %v1492_v38 = vld [vmem:[%s2532_s1 + $0x38] sm:$0xf0] }
  0x27   : > { %381 = vmatpush.bf16.msra.mxu0 %v266_v34  ;;  %1671 = vmatpush.bf16.msra.mxu2 %v266_v34  ;;  %v1641_v33 = vld [vmem:[%s2532_s1 + $0x74] sm:$0xf0]  ;;  %v948_v34 = vld [vmem:[%s2534_s3 + $0x48] sm:$0xff]  ;;  %v949_v36 = vld [vmem:[%s2534_s3 + $0x50] sm:$0xff] }
  0x28   : > { %430 = vmatpush.bf16.msra.mxu1 %v274_v35  ;;  %1679 = vmatpush.bf16.msra.mxu3 %v274_v35  ;;  %v1632_v35 = vld [vmem:[%s2532_s1 + $0x34] sm:$0xf]  ;;  %v950_v37 = vld [vmem:[%s2534_s3 + $0x58] sm:$0xff]  ;;  %v1523_v42 = vor.u32 %v1641_v33, %v1522_v32  ;;  %v951_v45 = vld [vmem:[%s2534_s3 + $0x60] sm:$0xff] }
  0x29   : > { %972 = vperm.xlu1 %1715, %v942_v16   ;;  %977 = vperm.xlu0 %1716, %v943_v18   ;;  %v1640_v39 = vld [vmem:[%s2532_s1 + $0x74] sm:$0xf]  ;;  %v1495_v43 = vor.u32 %v1632_v35, %v1492_v38 }
  0x2a   : > { %982 = vperm.xlu2 %1717, %v944_v19  }
  0x2b   : > { %382 = vmatpush.bf16.msra.mxu0 %v265_v40  ;;  %1672 = vmatpush.bf16.msra.mxu2 %v265_v40  ;;  %v1524_v40 = vld [vmem:[%s2532_s1 + $0x78] sm:$0xf0] }
  0x2c   : > { %431 = vmatpush.bf16.msra.mxu1 %v273_v41  ;;  %1680 = vmatpush.bf16.msra.mxu3 %v273_v41  ;;  %v1491_v41 = vor.u32 %v1633_v31, %v1490_v30  ;;  %v1527_v44 = vor.u32 %v1640_v39, %v1524_v40 }
  0x2f   : > { %383 = vmatpush.bf16.msra.mxu0 %v264_v48  ;;  %1673 = vmatpush.bf16.msra.mxu2 %v264_v48 }
  0x30   : > { %432 = vmatpush.bf16.msra.mxu1 %v272_v52  ;;  %1681 = vmatpush.bf16.msra.mxu3 %v272_v52 }
  0x31   : > { %987 = vperm.xlu1 %1715, %v945_v27   ;;  %992 = vperm.xlu0 %1716, %v946_v28  }
  0x32   : > { %384 = vmatmul.bf16.vlgmr.msra.gmra.mxu0 %v1467_v56  ;;  %404 = vmatmul.bf16.vlgmr.msra.gmra.mxu2 %v1499_v57 }
  0x33   : > { %433 = vmatmul.bf16.vlgmr.msra.gmra.mxu1 %v1471_v58  ;;  %453 = vmatmul.bf16.vlgmr.msra.gmra.mxu3 %v1503_v59 }
  0x34   : > { %997 = vperm.xlu2 %1717, %v947_v29  }
  0x39   : > { %1002 = vperm.xlu1 %1715, %v948_v34   ;;  %1007 = vperm.xlu0 %1716, %v949_v36  }
  0x3c   : > { %1012 = vperm.xlu2 %1717, %v950_v37  }
  0x41   : > { %1017 = vperm.xlu1 %1715, %v951_v45  }
  0x42   : > { %389 = vmatmul.bf16.gmra.mxu0 %v1475_v4  ;;  %409 = vmatmul.bf16.gmra.mxu2 %v1507_v5 }
  0x43   : > { %438 = vmatmul.bf16.gmra.mxu1 %v1479_v6  ;;  %458 = vmatmul.bf16.gmra.mxu3 %v1511_v7 }
  0x52   : > { %394 = vmatmul.bf16.gmra.mxu0 %v1483_v23  ;;  %414 = vmatmul.bf16.gmra.mxu2 %v1515_v24 }
  0x53   : > { %443 = vmatmul.bf16.gmra.mxu1 %v1487_v25  ;;  %463 = vmatmul.bf16.gmra.mxu3 %v1519_v26 }
  0x62   : > { %399 = vmatmul.bf16.gmra.mxu0 %v1491_v41  ;;  %419 = vmatmul.bf16.gmra.mxu2 %v1523_v42 }
  0x63   : > { %448 = vmatmul.bf16.gmra.mxu1 %v1495_v43  ;;  %468 = vmatmul.bf16.gmra.mxu3 %v1527_v44 }
  0xaf   : > { %v385_v46 = vpop.f32.mrf.mxu0 }
  0xb0   : > { %v434_v47 = vpop.f32.mrf.mxu1 }
  0xb1   : > { %v2038_v48 = vadd.f32 %v434_v47, %v385_v46  ;;  %v2102_v46 = vpop.permute.xlu0 %962  ;;  %v2104_v47 = vpop.permute.xlu2 %967 }
  0xb3   : > { %v475_v49 = vsel %vm474_vm0, %v2038_v48, 0.0 }
  0xb4   : > { %476 = vadd.xlane.f32.xlu0 %v475_v49  ;;  %v2106_v49 = vpop.permute.xlu1 %957 }
  0xb5   : > { %v405_v50 = vpop.f32.mrf.mxu2 }
  0xb6   : > { %v454_v51 = vpop.f32.mrf.mxu3 }
  0xb7   : > { %v2042_v52 = vadd.f32 %v454_v51, %v405_v50  ;;  %v387_v53 = vpop.f32.mrf.mxu0 }
  0xb8   : > { %v436_v54 = vpop.f32.mrf.mxu1 }
  0xb9   : > { %v2044_v55 = vadd.f32 %v436_v54, %v387_v53  ;;  %v499_v56 = vsel %vm474_vm0, %v2042_v52, 0.0  ;;  %v2108_v50 = vpop.permute.xlu0 %977  ;;  %v2110_v51 = vpop.permute.xlu2 %982 }
  0xba   : > { %500 = vadd.xlane.f32.xlu2 %v499_v56 }
  0xbb   : > { %v478_v57 = vsel %vm474_vm0, %v2044_v55, 0.0 }
  0xbc   : > { %479 = vadd.xlane.f32.xlu0 %v478_v57  ;;  %v2112_v53 = vpop.permute.xlu1 %972 }
  0xbd   : > { %v407_v58 = vpop.f32.mrf.mxu2 }
  0xbe   : > { %v456_v59 = vpop.f32.mrf.mxu3 }
  0xbf   : > { %v2050_v60 = vadd.f32 %v456_v59, %v407_v58  ;;  %v390_v61 = vpop.f32.mrf.mxu0 }
  0xc0   : > { %v439_v62 = vpop.f32.mrf.mxu1 }
  0xc1   : > { %v2052_v63 = vadd.f32 %v439_v62, %v390_v61  ;;  %v502_v0 = vsel %vm474_vm0, %v2050_v60, 0.0  ;;  %v2114_v54 = vpop.permute.xlu0 %992  ;;  %v2116_v56 = vpop.permute.xlu2 %997 }
  0xc3   : > { %v481_v1 = vsel %vm474_vm0, %v2052_v63, 0.0 }
  0xc4   : > { %503 = vadd.xlane.f32.xlu0 %v502_v0  ;;  %482 = vadd.xlane.f32.xlu1 %v481_v1  ;;  %v2118_v57 = vpop.permute.xlu1 %987 }
  0xc5   : > { %v410_v2 = vpop.f32.mrf.mxu2 }
  0xc6   : > { %v459_v3 = vpop.f32.mrf.mxu3 }
  0xc7   : > { %v2058_v4 = vadd.f32 %v459_v3, %v410_v2  ;;  %v392_v5 = vpop.f32.mrf.mxu0 }
  0xc8   : > { %v441_v6 = vpop.f32.mrf.mxu1 }
  0xc9   : > { %v505_v7 = vsel %vm474_vm0, %v2058_v4, 0.0  ;;  %v2062_v10 = vadd.f32 %v441_v6, %v392_v5  ;;  %v2120_v58 = vpop.permute.xlu0 %1007  ;;  %v2122_v59 = vpop.permute.xlu2 %1012 }
  0xcb   : > { %v484_v16 = vsel %vm474_vm0, %v2062_v10, 0.0 }
  0xcc   : > { %506 = vadd.xlane.f32.xlu1 %v505_v7  ;;  %v2124_v61 = vpop.permute.xlu1 %1002 }
  0xcd   : > { %v412_v8 = vpop.f32.mrf.mxu2 }
  0xce   : > { %v461_v9 = vpop.f32.mrf.mxu3 }
  0xcf   : > { %v2064_v11 = vadd.f32 %v461_v9, %v412_v8  ;;  %v395_v12 = vpop.f32.mrf.mxu0 }
  0xd0   : > { %v444_v13 = vpop.f32.mrf.mxu1 }
  0xd1   : > { %v508_v14 = vsel %vm474_vm0, %v2064_v11, 0.0  ;;  %v2068_v15 = vadd.f32 %v444_v13, %v395_v12 }
  0xd2   : > { %509 = vadd.xlane.f32.xlu2 %v508_v14 }
  0xd3   : > { %v487_v21 = vsel %vm474_vm0, %v2068_v15, 0.0 }
  0xd4   : > { %485 = vadd.xlane.f32.xlu1 %v484_v16  ;;  %v2132_v7 = vpop.permute.xlu1 %1017 }
  0xd5   : > { %v415_v17 = vpop.f32.mrf.mxu2 }
  0xd6   : > { %v464_v18 = vpop.f32.mrf.mxu3 }
  0xd7   : > { %v2072_v19 = vadd.f32 %v464_v18, %v415_v17  ;;  %v397_v20 = vpop.f32.mrf.mxu0 }
  0xd8   : > { %v446_v22 = vpop.f32.mrf.mxu1 }
  0xd9   : > { %v511_v23 = vsel %vm474_vm0, %v2072_v19, 0.0  ;;  %v2078_v24 = vadd.f32 %v446_v22, %v397_v20 }
  0xda   : > { %512 = vadd.xlane.f32.xlu0 %v511_v23  ;;  %488 = vadd.xlane.f32.xlu2 %v487_v21 }
  0xdb   : > { %v490_v32 = vsel %vm474_vm0, %v2078_v24, 0.0 }
  0xdd   : > { %v417_v25 = vpop.f32.mrf.mxu2 }
  0xde   : > { %v466_v26 = vpop.f32.mrf.mxu3 }
  0xdf   : > { %v2080_v27 = vadd.f32 %v466_v26, %v417_v25  ;;  %v400_v28 = vpop.f32.mrf.mxu0 }
  0xe0   : > { %v449_v29 = vpop.f32.mrf.mxu1 }
  0xe1   : > { %v2082_v30 = vadd.f32 %v449_v29, %v400_v28  ;;  %v514_v31 = vsel %vm474_vm0, %v2080_v27, 0.0 }
  0xe2   : > { %515 = vadd.xlane.f32.xlu1 %v514_v31  ;;  %491 = vadd.xlane.f32.xlu2 %v490_v32 }
  0xe3   : > { %v493_v33 = vsel %vm474_vm0, %v2082_v30, 0.0 }
  0xe4   : > { %494 = vadd.xlane.f32.xlu0 %v493_v33 }
  0xe5   : > { %v420_v34 = vpop.f32.mrf.mxu2 }
  0xe6   : > { %v469_v35 = vpop.f32.mrf.mxu3 }
  0xe7   : > { %v2090_v36 = vadd.f32 %v469_v35, %v420_v34  ;;  %v402_v37 = vpop.f32.mrf.mxu0 }
  0xe8   : > { %v451_v38 = vpop.f32.mrf.mxu1 }
  0xe9   : > { %v2092_v39 = vadd.f32 %v451_v38, %v402_v37  ;;  %v517_v40 = vsel %vm474_vm0, %v2090_v36, 0.0 }
  0xea   : > { %518 = vadd.xlane.f32.xlu2 %v517_v40 }
  0xeb   : > { %v496_v41 = vsel %vm474_vm0, %v2092_v39, 0.0 }
  0xec   : > { %497 = vadd.xlane.f32.xlu1 %v496_v41 }
  0xed   : > { %v422_v42 = vpop.f32.mrf.mxu2 }
  0xee   : > { %v471_v43 = vpop.f32.mrf.mxu3 }
  0xef   : > { %v2098_v44 = vadd.f32 %v471_v43, %v422_v42 }
  0xf1   : > { %v520_v45 = vsel %vm474_vm0, %v2098_v44, 0.0 }
  0xf2   : > { %521 = vadd.xlane.f32.xlu0 %v520_v45 }
 0x127   : > { %v477_v62 = vpop.xlane.xlu0 %476 }
 0x128   : > { %v523_v0 = vmul.f32 0.020408163, %v477_v62 }
 0x12a   : > { %v2127_v1 = vsub.f32 %v2038_v48, %v523_v0 }
 0x12c   : > { %v555_v2 = vmul.f32 %v2127_v1, %v2127_v1 }
 0x12d   : > { %v501_v3 = vpop.xlane.xlu2 %500 }
 0x12e   : > { %v531_v5 = vmul.f32 0.020408163, %v501_v3  ;;  %v571_v6 = vsel %vm474_vm0, %v555_v2, 0.0 }
 0x12f   : > { %v480_v8 = vpop.xlane.xlu0 %479  ;;  %572 = vadd.xlane.f32.xlu1 %v571_v6 }
 0x130   : > { %v2135_v9 = vsub.f32 %v2042_v52, %v531_v5  ;;  %v524_v12 = vmul.f32 0.020408163, %v480_v8 }
 0x132   : > { %v2138_v13 = vsub.f32 %v2044_v55, %v524_v12  ;;  %v563_v48 = vmul.f32 %v2135_v9, %v2135_v9 }
 0x134   : > { %v595_v14 = vsel %vm474_vm0, %v563_v48, 0.0  ;;  %v556_v16 = vmul.f32 %v2138_v13, %v2138_v13 }
 0x135   : > { %596 = vadd.xlane.f32.xlu0 %v595_v14 }
 0x136   : > { %v574_v17 = vsel %vm474_vm0, %v556_v16, 0.0 }
 0x137   : > { %v504_v18 = vpop.xlane.xlu0 %503  ;;  %v483_v20 = vpop.xlane.xlu1 %482  ;;  %575 = vadd.xlane.f32.xlu2 %v574_v17 }
 0x138   : > { %v532_v52 = vmul.f32 0.020408163, %v504_v18  ;;  %v525_v21 = vmul.f32 0.020408163, %v483_v20 }
 0x13a   : > { %v2147_v22 = vsub.f32 %v2050_v60, %v532_v52  ;;  %v2150_v55 = vsub.f32 %v2052_v63, %v525_v21 }
 0x13c   : > { %v557_v23 = vmul.f32 %v2150_v55, %v2150_v55  ;;  %v564_v25 = vmul.f32 %v2147_v22, %v2147_v22 }
 0x13e   : > { %v577_v26 = vsel %vm474_vm0, %v557_v23, 0.0  ;;  %v598_v28 = vsel %vm474_vm0, %v564_v25, 0.0 }
 0x13f   : > { %v507_v29 = vpop.xlane.xlu1 %506  ;;  %578 = vadd.xlane.f32.xlu0 %v577_v26  ;;  %599 = vadd.xlane.f32.xlu1 %v598_v28 }
 0x140   : > { %v533_v31 = vmul.f32 0.020408163, %v507_v29 }
 0x142   : > { %v2159_v60 = vsub.f32 %v2058_v4, %v533_v31 }
 0x144   : > { %v565_v63 = vmul.f32 %v2159_v60, %v2159_v60 }
 0x145   : > { %v510_v32 = vpop.xlane.xlu2 %509 }
 0x146   : > { %v534_v33 = vmul.f32 0.020408163, %v510_v32  ;;  %v601_v34 = vsel %vm474_vm0, %v565_v63, 0.0 }
 0x147   : > { %v486_v35 = vpop.xlane.xlu1 %485  ;;  %602 = vadd.xlane.f32.xlu2 %v601_v34 }
 0x148   : > { %v2165_v37 = vsub.f32 %v2064_v11, %v534_v33  ;;  %v526_v38 = vmul.f32 0.020408163, %v486_v35 }
 0x14a   : > { %v2168_v40 = vsub.f32 %v2062_v10, %v526_v38  ;;  %v566_v4 = vmul.f32 %v2165_v37, %v2165_v37 }
 0x14c   : > { %v604_v41 = vsel %vm474_vm0, %v566_v4, 0.0  ;;  %v558_v42 = vmul.f32 %v2168_v40, %v2168_v40 }
 0x14d   : > { %v513_v43 = vpop.xlane.xlu0 %512  ;;  %v489_v45 = vpop.xlane.xlu2 %488  ;;  %605 = vadd.xlane.f32.xlu0 %v604_v41 }
 0x14e   : > { %v535_v62 = vmul.f32 0.020408163, %v513_v43  ;;  %v527_v0 = vmul.f32 0.020408163, %v489_v45  ;;  %v580_v11 = vsel %vm474_vm0, %v558_v42, 0.0 }
 0x14f   : > { %581 = vadd.xlane.f32.xlu1 %v580_v11 }
 0x150   : > { %v2177_v2 = vsub.f32 %v2072_v19, %v535_v62  ;;  %v2180_v10 = vsub.f32 %v2068_v15, %v527_v0 }
 0x152   : > { %v559_v3 = vmul.f32 %v2180_v10, %v2180_v10  ;;  %v567_v5 = vmul.f32 %v2177_v2, %v2177_v2 }
 0x154   : > { %v583_v6 = vsel %vm474_vm0, %v559_v3, 0.0  ;;  %v607_v16 = vsel %vm474_vm0, %v567_v5, 0.0 }
 0x155   : > { %v516_v8 = vpop.xlane.xlu1 %515  ;;  %584 = vadd.xlane.f32.xlu2 %v583_v6  ;;  %v492_v12 = vpop.xlane.xlu2 %491 }
 0x156   : > { %v536_v48 = vmul.f32 0.020408163, %v516_v8  ;;  %v528_v14 = vmul.f32 0.020408163, %v492_v12 }
 0x157   : > { %v495_v19 = vpop.xlane.xlu0 %494  ;;  %608 = vadd.xlane.f32.xlu1 %v607_v16 }
 0x158   : > { %v2189_v15 = vsub.f32 %v2080_v27, %v536_v48  ;;  %v2192_v17 = vsub.f32 %v2078_v24, %v528_v14  ;;  %v529_v18 = vmul.f32 0.020408163, %v495_v19 }
 0x15a   : > { %v2195_v20 = vsub.f32 %v2082_v30, %v529_v18  ;;  %v568_v52 = vmul.f32 %v2189_v15, %v2189_v15  ;;  %v560_v21 = vmul.f32 %v2192_v17, %v2192_v17 }
 0x15c   : > { %v610_v23 = vsel %vm474_vm0, %v568_v52, 0.0  ;;  %v586_v25 = vsel %vm474_vm0, %v560_v21, 0.0  ;;  %v561_v27 = vmul.f32 %v2195_v20, %v2195_v20 }
 0x15d   : > { %611 = vadd.xlane.f32.xlu2 %v610_v23  ;;  %v519_v24 = vpop.xlane.xlu2 %518  ;;  %587 = vadd.xlane.f32.xlu0 %v586_v25 }
 0x15e   : > { %v537_v26 = vmul.f32 0.020408163, %v519_v24  ;;  %v589_v30 = vsel %vm474_vm0, %v561_v27, 0.0 }
 0x15f   : > { %590 = vadd.xlane.f32.xlu1 %v589_v30  ;;  %v498_v28 = vpop.xlane.xlu1 %497 }
 0x160   : > { %v2207_v29 = vsub.f32 %v2090_v36, %v537_v26  ;;  %v530_v31 = vmul.f32 0.020408163, %v498_v28  ;;  %v635_v28 = vld [vmem:[%s2533_s2] sm:$0xff] }
 0x162   : > { %v2210_v63 = vsub.f32 %v2092_v39, %v530_v31  ;;  %v569_v32 = vmul.f32 %v2207_v29, %v2207_v29 }
 0x164   : > { %v613_v33 = vsel %vm474_vm0, %v569_v32, 0.0  ;;  %v562_v34 = vmul.f32 %v2210_v63, %v2210_v63 }
 0x165   : > { %614 = vadd.xlane.f32.xlu0 %v613_v33  ;;  %v522_v35 = vpop.xlane.xlu0 %521 }
 0x166   : > { %v538_v38 = vmul.f32 0.020408163, %v522_v35  ;;  %v592_v4 = vsel %vm474_vm0, %v562_v34, 0.0 }
 0x167   : > { %593 = vadd.xlane.f32.xlu2 %v592_v4 }
 0x168   : > { %v2219_v36 = vsub.f32 %v2098_v44, %v538_v38 }
 0x16a   : > { %v570_v39 = vmul.f32 %v2219_v36, %v2219_v36 }
 0x16c   : > { %v616_v41 = vsel %vm474_vm0, %v570_v39, 0.0 }
 0x16d   : > { %617 = vadd.xlane.f32.xlu1 %v616_v41 }
 0x1a2   : > { %v573_v42 = vpop.xlane.xlu1 %572 }
 0x1a3   : > { %v619_v43 = vmul.f32 0.020408163, %v573_v42 }
 0x1a5   : > { %v651_v45 = vadd.f32 0.001, %v619_v43 }
 0x1a7   : > { %1718 = vrsqrt.f32 %v651_v45  ;;  %vm673_vm2 = vweird.f32 %v651_v45 }
 0x1a8   : > { %v597_v62 = vpop.xlane.xlu0 %596 }
 0x1a9   : > { %v627_v0 = vmul.f32 0.020408163, %v597_v62 }
 0x1aa   : > { %v576_v11 = vpop.xlane.xlu2 %575 }
 0x1ab   : > { %v659_v3 = vadd.f32 0.001, %v627_v0  ;;  %v620_v5 = vmul.f32 0.020408163, %v576_v11  ;;  %v643_v0 = vld [vmem:[%s2533_s2 + $0x40] sm:$0xff] }
 0x1ad   : > { %v1719_v6 = vpop.eup %1718  ;;  %1720 = vrsqrt.f32 %v659_v3  ;;  %v652_v8 = vadd.f32 0.001, %v620_v5  ;;  %vm753_vm5 = vweird.f32 %v659_v3 }
 0x1ae   : > { %v668_v44 = vmul.f32 %v1719_v6, %v651_v45  ;;  %vm674_vm1 = vweird.f32 %v1719_v6 }
 0x1af   : > { %1722 = vrsqrt.f32 %v652_v8  ;;  %vm675_vm3 = vmor %vm673_vm2, %vm674_vm1  ;;  %vm683_vm8 = vweird.f32 %v652_v8 }
 0x1b0   : > { %v669_v12 = vmul.f32 %v1719_v6, %v668_v44 }
 0x1b2   : > { %v670_v48 = vmul.f32 0.5, %v669_v12  ;;  %v579_v14 = vpop.xlane.xlu0 %578  ;;  %v600_v16 = vpop.xlane.xlu1 %599 }
 0x1b3   : > { %v1721_v19 = vpop.eup %1720  ;;  %v621_v18 = vmul.f32 0.020408163, %v579_v14  ;;  %v628_v52 = vmul.f32 0.020408163, %v600_v16 }
 0x1b4   : > { %v671_v21 = vsub.f32 1.5, %v670_v48  ;;  %v748_v23 = vmul.f32 %v1721_v19, %v659_v3  ;;  %vm754_vm4 = vweird.f32 %v1721_v19 }
 0x1b5   : > { %v2224_v25 = vpop.eup %1722  ;;  %v653_v27 = vadd.f32 0.001, %v621_v18  ;;  %v2226_v24 = vadd.f32 0.001, %v628_v52  ;;  %vm755_vm6 = vmor %vm753_vm5, %vm754_vm4 }
 0x1b6   : > { %v749_v26 = vmul.f32 %v1721_v19, %v748_v23  ;;  %v678_v30 = vmul.f32 %v2224_v25, %v652_v8  ;;  %v672_v31 = vmul.f32 %v1719_v6, %v671_v21  ;;  %vm684_vm7 = vweird.f32 %v2224_v25  ;;  %v636_v8 = vld [vmem:[%s2533_s2 + $0x8] sm:$0xff] }
 0x1b7   : > { %1724 = vrsqrt.f32 %v653_v27  ;;  %vm2245_vm9 = vmor %vm683_vm8, %vm684_vm7  ;;  %vm693_vm12 = vweird.f32 %v653_v27  ;;  %vm763_vm14 = vweird.f32 %v2226_v24 }
 0x1b8   : > { %v750_v32 = vmul.f32 0.5, %v749_v26  ;;  %v679_v33 = vmul.f32 %v2224_v25, %v678_v30  ;;  %1726 = vrsqrt.f32 %v2226_v24  ;;  %v676_v34 = vsel %vm675_vm3, %v1719_v6, %v672_v31 }
 0x1b9   : > { %v827_v35 = vmul.f32 %v676_v34, %v635_v28 }
 0x1ba   : > { %v751_v38 = vsub.f32 1.5, %v750_v32  ;;  %v680_v4 = vmul.f32 0.5, %v679_v33  ;;  %v603_v39 = vpop.xlane.xlu2 %602 }
 0x1bb   : > { %v629_v41 = vmul.f32 0.020408163, %v603_v39  ;;  %845 = vperm.xlu2 %1717, %v827_v35   ;;  %v644_v39 = vld [vmem:[%s2533_s2 + $0x48] sm:$0xff] }
 0x1bc   : > { %v752_v42 = vmul.f32 %v1721_v19, %v751_v38  ;;  %v681_v45 = vsub.f32 1.5, %v680_v4  ;;  %v637_v38 = vld [vmem:[%s2533_s2 + $0x10] sm:$0xff] }
 0x1bd   : > { %v1725_v43 = vpop.eup %1724  ;;  %v2234_v62 = vadd.f32 0.001, %v629_v41 }
 0x1be   : > { %v1727_v11 = vpop.eup %1726  ;;  %v688_v5 = vmul.f32 %v1725_v43, %v653_v27  ;;  %v756_v6 = vsel %vm755_vm6, %v1721_v19, %v752_v42  ;;  %v682_v18 = vmul.f32 %v2224_v25, %v681_v45  ;;  %vm694_vm10 = vweird.f32 %v1725_v43 }
 0x1bf   : > { %v758_v44 = vmul.f32 %v1727_v11, %v2226_v24  ;;  %1728 = vrsqrt.f32 %v2234_v62  ;;  %v835_v3 = vmul.f32 %v756_v6, %v643_v0  ;;  %vm764_vm11 = vweird.f32 %v1727_v11  ;;  %vm695_vm13 = vmor %vm693_vm12, %vm694_vm10 }
 0x1c0   : > { %v689_v12 = vmul.f32 %v1725_v43, %v688_v5  ;;  %v606_v48 = vpop.xlane.xlu0 %605  ;;  %v686_v34 = vsel %vm2245_vm9, %v2224_v25, %v682_v18  ;;  %vm765_vm15 = vmor %vm763_vm14, %vm764_vm11  ;;  %vm773_vm1 = vweird.f32 %v2234_v62 }
 0x1c1   : > { %v759_v14 = vmul.f32 %v1727_v11, %v758_v44  ;;  %v630_v16 = vmul.f32 0.020408163, %v606_v48  ;;  %885 = vperm.xlu0 %1716, %v835_v3   ;;  %v828_v42 = vmul.f32 %v686_v34, %v636_v8 }
 0x1c2   : > { %v690_v52 = vmul.f32 0.5, %v689_v12  ;;  %v582_v21 = vpop.xlane.xlu1 %581 }
 0x1c3   : > { %v760_v23 = vmul.f32 0.5, %v759_v14  ;;  %v2243_v26 = vadd.f32 0.001, %v630_v16  ;;  %v622_v19 = vmul.f32 0.020408163, %v582_v21 }
 0x1c4   : > { %v691_v28 = vsub.f32 1.5, %v690_v52 }
 0x1c5   : > { %v1729_v31 = vpop.eup %1728  ;;  %v761_v32 = vsub.f32 1.5, %v760_v23  ;;  %1730 = vrsqrt.f32 %v2243_v26  ;;  %v2250_v33 = vadd.f32 0.001, %v622_v19  ;;  %v645_v23 = vld [vmem:[%s2533_s2 + $0x50] sm:$0xff]  ;;  %vm783_vm4 = vweird.f32 %v2243_v26 }
 0x1c6   : > { %v768_v35 = vmul.f32 %v1729_v31, %v2234_v62  ;;  %v692_v4 = vmul.f32 %v1725_v43, %v691_v28  ;;  %vm774_vm0 = vweird.f32 %v1729_v31 }
 0x1c7   : > { %1732 = vrsqrt.f32 %v2250_v33  ;;  %v762_v41 = vmul.f32 %v1727_v11, %v761_v32  ;;  %vm775_vm2 = vmor %vm773_vm1, %vm774_vm0  ;;  %vm703_vm7 = vweird.f32 %v2250_v33 }
 0x1c8   : > { %v769_v25 = vmul.f32 %v1729_v31, %v768_v35  ;;  %v585_v27 = vpop.xlane.xlu2 %584  ;;  %v696_v45 = vsel %vm695_vm13, %v1725_v43, %v692_v4 }
 0x1c9   : > { %v623_v0 = vmul.f32 0.020408163, %v585_v27  ;;  %v829_v5 = vmul.f32 %v696_v45, %v637_v38  ;;  %v766_v6 = vsel %vm765_vm15, %v1727_v11, %v762_v41  ;;  %850 = vperm.xlu0 %1716, %v828_v42  }
 0x1ca   : > { %v770_v44 = vmul.f32 0.5, %v769_v25  ;;  %v609_v12 = vpop.xlane.xlu1 %608  ;;  %v836_v24 = vmul.f32 %v766_v6, %v644_v39 }
 0x1cb   : > { %v1731_v48 = vpop.eup %1730  ;;  %v2268_v3 = vadd.f32 0.001, %v623_v0  ;;  %v631_v14 = vmul.f32 0.020408163, %v609_v12  ;;  %855 = vperm.xlu1 %1715, %v829_v5   ;;  %v646_v12 = vld [vmem:[%s2533_s2 + $0x58] sm:$0xff] }
 0x1cc   : > { %v771_v16 = vsub.f32 1.5, %v770_v44  ;;  %v778_v18 = vmul.f32 %v1731_v48, %v2243_v26  ;;  %890 = vperm.xlu2 %1717, %v836_v24   ;;  %vm784_vm3 = vweird.f32 %v1731_v48 }
 0x1cd   : > { %v1733_v52 = vpop.eup %1732  ;;  %1734 = vrsqrt.f32 %v2268_v3  ;;  %v2272_v43 = vadd.f32 0.001, %v631_v14  ;;  %vm785_vm6 = vmor %vm783_vm4, %vm784_vm3  ;;  %vm713_vm10 = vweird.f32 %v2268_v3 }
 0x1ce   : > { %v779_v11 = vmul.f32 %v1731_v48, %v778_v18  ;;  %v698_v21 = vmul.f32 %v1733_v52, %v2250_v33  ;;  %v772_v19 = vmul.f32 %v1729_v31, %v771_v16  ;;  %vm704_vm5 = vweird.f32 %v1733_v52  ;;  %v638_v16 = vld [vmem:[%s2533_s2 + $0x18] sm:$0xff] }
 0x1cf   : > { %1736 = vrsqrt.f32 %v2272_v43  ;;  %vm705_vm8 = vmor %vm703_vm7, %vm704_vm5  ;;  %vm793_vm14 = vweird.f32 %v2272_v43 }
 0x1d0   : > { %v780_v30 = vmul.f32 0.5, %v779_v11  ;;  %v699_v28 = vmul.f32 %v1733_v52, %v698_v21  ;;  %v612_v32 = vpop.xlane.xlu2 %611  ;;  %v588_v8 = vpop.xlane.xlu0 %587  ;;  %v776_v34 = vsel %vm775_vm2, %v1729_v31, %v772_v19 }
 0x1d1   : > { %v632_v35 = vmul.f32 0.020408163, %v612_v32  ;;  %v624_v38 = vmul.f32 0.020408163, %v588_v8  ;;  %v837_v4 = vmul.f32 %v776_v34, %v645_v23 }
 0x1d2   : > { %v781_v62 = vsub.f32 1.5, %v780_v30  ;;  %v700_v39 = vmul.f32 0.5, %v699_v28  ;;  %v591_v41 = vpop.xlane.xlu1 %590 }
 0x1d3   : > { %v2280_v25 = vpop.eup %1734  ;;  %v2282_v27 = vadd.f32 0.001, %v632_v35  ;;  %v2284_v42 = vadd.f32 0.001, %v624_v38  ;;  %v625_v45 = vmul.f32 0.020408163, %v591_v41  ;;  %895 = vperm.xlu1 %1715, %v837_v4  }
 0x1d4   : > { %v701_v0 = vsub.f32 1.5, %v700_v39  ;;  %v708_v5 = vmul.f32 %v2280_v25, %v2268_v3  ;;  %v782_v31 = vmul.f32 %v1731_v48, %v781_v62  ;;  %vm714_vm9 = vweird.f32 %v2280_v25  ;;  %v639_v3 = vld [vmem:[%s2533_s2 + $0x20] sm:$0xff] }
 0x1d5   : > { %v2288_v6 = vpop.eup %1736  ;;  %1738 = vrsqrt.f32 %v2282_v27  ;;  %v2292_v44 = vadd.f32 0.001, %v625_v45  ;;  %vm2320_vm11 = vmor %vm713_vm10, %vm714_vm9  ;;  %vm723_vm0 = vweird.f32 %v2284_v42  ;;  %vm803_vm4 = vweird.f32 %v2282_v27 }
 0x1d6   : > { %v709_v24 = vmul.f32 %v2280_v25, %v708_v5  ;;  %v788_v14 = vmul.f32 %v2288_v6, %v2272_v43  ;;  %1740 = vrsqrt.f32 %v2284_v42  ;;  %v786_v26 = vsel %vm785_vm6, %v1731_v48, %v782_v31 }
 0x1d7   : > { %1742 = vrsqrt.f32 %v2292_v44  ;;  %v702_v18 = vmul.f32 %v1733_v52, %v701_v0  ;;  %v838_v19 = vmul.f32 %v786_v26, %v646_v12  ;;  %vm794_vm12 = vweird.f32 %v2288_v6 }
 0x1d8   : > { %v710_v11 = vmul.f32 0.5, %v709_v24  ;;  %v789_v21 = vmul.f32 %v2288_v6, %v788_v14  ;;  %v615_v23 = vpop.xlane.xlu0 %614  ;;  %vm2343_vm15 = vmor %vm793_vm14, %vm794_vm12 }
 0x1d9   : > { %v633_v30 = vmul.f32 0.020408163, %v615_v23  ;;  %v706_v28 = vsel %vm705_vm8, %v1733_v52, %v702_v18  ;;  %900 = vperm.xlu0 %1716, %v838_v19   ;;  %vm733_vm8 = vweird.f32 %v2292_v44 }
 0x1da   : > { %v711_v32 = vsub.f32 1.5, %v710_v11  ;;  %v594_v8 = vpop.xlane.xlu2 %593  ;;  %v830_v33 = vmul.f32 %v706_v28, %v638_v16  ;;  %v790_v48 = vmul.f32 0.5, %v789_v21 }
 0x1db   : > { %v2307_v34 = vpop.eup %1738  ;;  %v2310_v35 = vadd.f32 0.001, %v633_v30  ;;  %v626_v38 = vmul.f32 0.020408163, %v594_v8 }
 0x1dc   : > { %v1741_v4 = vpop.eup %1740  ;;  %v798_v62 = vmul.f32 %v2307_v34, %v2282_v27  ;;  %860 = vperm.xlu2 %1717, %v830_v33   ;;  %v712_v39 = vmul.f32 %v2280_v25, %v711_v32  ;;  %v791_v12 = vsub.f32 1.5, %v790_v48  ;;  %vm804_vm2 = vweird.f32 %v2307_v34 }
 0x1dd   : > { %v2315_v52 = vpop.eup %1742  ;;  %v718_v41 = vmul.f32 %v1741_v4, %v2284_v42  ;;  %1744 = vrsqrt.f32 %v2310_v35  ;;  %v2327_v31 = vadd.f32 0.001, %v626_v38  ;;  %vm724_vm13 = vweird.f32 %v1741_v4  ;;  %v640_v38 = vld [vmem:[%s2533_s2 + $0x28] sm:$0xff]  ;;  %vm2365_vm6 = vmor %vm803_vm4, %vm804_vm2 }
 0x1de   : > { %v799_v0 = vmul.f32 %v2307_v34, %v798_v62  ;;  %v728_v5 = vmul.f32 %v2315_v52, %v2292_v44  ;;  %v716_v14 = vsel %vm2320_vm11, %v2280_v25, %v712_v39  ;;  %v792_v8 = vmul.f32 %v2288_v6, %v791_v12  ;;  %vm725_vm1 = vmor %vm723_vm0, %vm724_vm13 }
 0x1df   : > { %v719_v24 = vmul.f32 %v1741_v4, %v718_v41  ;;  %1746 = vrsqrt.f32 %v2327_v31  ;;  %v831_v23 = vmul.f32 %v716_v14, %v639_v3  ;;  %vm734_vm5 = vweird.f32 %v2315_v52 }
 0x1e0   : > { %v729_v26 = vmul.f32 %v2315_v52, %v728_v5  ;;  %v618_v16 = vpop.xlane.xlu1 %617  ;;  %v800_v18 = vmul.f32 0.5, %v799_v0  ;;  %v647_v5 = vld [vmem:[%s2533_s2 + $0x60] sm:$0xff]  ;;  %v796_v42 = vsel %vm2343_vm15, %v2288_v6, %v792_v8  ;;  %vm813_vm7 = vweird.f32 %v2310_v35  ;;  %vm735_vm10 = vmor %vm733_vm8, %vm734_vm5 }
 0x1e1   : > { %v720_v11 = vmul.f32 0.5, %v719_v24  ;;  %v634_v21 = vmul.f32 0.020408163, %v618_v16  ;;  %v839_v16 = vmul.f32 %v796_v42, %v647_v5  ;;  %vm743_vm12 = vweird.f32 %v2327_v31 }
 0x1e2   : > { %v730_v28 = vmul.f32 0.5, %v729_v26  ;;  %v801_v48 = vsub.f32 1.5, %v800_v18 }
 0x1e3   : > { %v1745_v19 = vpop.eup %1744  ;;  %v721_v30 = vsub.f32 1.5, %v720_v11  ;;  %v2338_v32 = vadd.f32 0.001, %v634_v21 }
 0x1e4   : > { %v808_v25 = vmul.f32 %v1745_v19, %v2310_v35  ;;  %865 = vperm.xlu2 %1717, %v831_v23   ;;  %v731_v41 = vsub.f32 1.5, %v730_v28  ;;  %v802_v14 = vmul.f32 %v2307_v34, %v801_v48  ;;  %vm814_vm3 = vweird.f32 %v1745_v19  ;;  %v649_v23 = vld [vmem:[%s2533_s2 + $0x70] sm:$0xff]  ;;  %v648_v28 = vld [vmem:[%s2533_s2 + $0x68] sm:$0xff] }
 0x1e5   : > { %1748 = vrsqrt.f32 %v2338_v32  ;;  %v722_v62 = vmul.f32 %v1741_v4, %v721_v30  ;;  %v1747_v39 = vpop.eup %1746  ;;  %vm815_vm9 = vmor %vm813_vm7, %vm814_vm3  ;;  %v641_v48 = vld [vmem:[%s2533_s2 + $0x30] sm:$0xff]  ;;  %vm823_vm15 = vweird.f32 %v2338_v32 }
 0x1e6   : > { %v809_v43 = vmul.f32 %v1745_v19, %v808_v25  ;;  %v738_v45 = vmul.f32 %v1747_v39, %v2327_v31  ;;  %v732_v11 = vmul.f32 %v2315_v52, %v731_v41  ;;  %v806_v35 = vsel %vm2365_vm6, %v2307_v34, %v802_v14  ;;  %v650_v31 = vld [vmem:[%s2533_s2 + $0x78] sm:$0xff] }
 0x1e7   : > { %v726_v0 = vsel %vm725_vm1, %v1741_v4, %v722_v62  ;;  %v840_v62 = vmul.f32 %v806_v35, %v648_v28  ;;  %vm744_vm11 = vweird.f32 %v1747_v39  ;;  %vm1067_vm1 = vcmask 396288  }
 0x1e8   : > { %v810_v12 = vmul.f32 0.5, %v809_v43  ;;  %v832_v24 = vmul.f32 %v726_v0, %v640_v38  ;;  %v739_v3 = vmul.f32 %v1747_v39, %v738_v45  ;;  %v736_v44 = vsel %vm735_vm10, %v2315_v52, %v732_v11  ;;  %vm745_vm14 = vmor %vm743_vm12, %vm744_vm11  ;;  %v642_v52 = vld [vmem:[%s2533_s2 + $0x38] sm:$0xff]  ;;  %v952_v0 = vld [vmem:[%s2534_s3 + $0x68] sm:$0xff] }
 0x1e9   : > { %v833_v45 = vmul.f32 %v736_v44, %v641_v48 }
 0x1ea   : > { %v811_v26 = vsub.f32 1.5, %v810_v12  ;;  %870 = vperm.xlu1 %1715, %v832_v24   ;;  %v740_v18 = vmul.f32 0.5, %v739_v3 }
 0x1eb   : > { %v1749_v4 = vpop.eup %1748 }
 0x1ec   : > { %v818_v21 = vmul.f32 %v1749_v4, %v2338_v32  ;;  %905 = vperm.xlu2 %1717, %v839_v16   ;;  %v812_v30 = vmul.f32 %v1745_v19, %v811_v26  ;;  %v741_v27 = vsub.f32 1.5, %v740_v18  ;;  %vm824_vm13 = vweird.f32 %v1749_v4  ;;  %v954_v32 = vld [vmem:[%s2534_s3 + $0x78] sm:$0xff] }
 0x1ed   : > { %vm825_vm0 = vmor %vm823_vm15, %vm824_vm13 }
 0x1ee   : > { %v819_v8 = vmul.f32 %v1749_v4, %v818_v21  ;;  %v816_v25 = vsel %vm815_vm9, %v1745_v19, %v812_v30  ;;  %v742_v43 = vmul.f32 %v1747_v39, %v741_v27 }
 0x1ef   : > { %v841_v33 = vmul.f32 %v816_v25, %v649_v23 }
 0x1f0   : > { %v820_v38 = vmul.f32 0.5, %v819_v8  ;;  %v746_v19 = vsel %vm745_vm14, %v1747_v39, %v742_v43  ;;  %v953_v39 = vld [vmem:[%s2534_s3 + $0x70] sm:$0xff] }
 0x1f1   : > { %915 = vperm.xlu0 %1716, %v841_v33   ;;  %v834_v42 = vmul.f32 %v746_v19, %v642_v52 }
 0x1f2   : > { %v821_v41 = vsub.f32 1.5, %v820_v38  ;;  %910 = vperm.xlu1 %1715, %v840_v62  }
 0x1f4   : > { %875 = vperm.xlu2 %1717, %v833_v45   ;;  %v822_v34 = vmul.f32 %v1749_v4, %v821_v41 }
 0x1f6   : > { %v826_v5 = vsel %vm825_vm0, %v1749_v4, %v822_v34 }
 0x1f7   : > { %v842_v12 = vmul.f32 %v826_v5, %v650_v31 }
 0x1f9   : > { %1022 = vperm.xlu0 %1716, %v952_v0  }
 0x1fa   : > { %880 = vperm.xlu1 %1715, %v834_v42  }
 0x1fc   : > { %920 = vperm.xlu2 %1717, %v842_v12  }
 0x202   : > { %1032 = vperm.xlu1 %1715, %v954_v32  }
 0x204   : > { %1027 = vperm.xlu2 %1717, %v953_v39  }
 0x215   : > { %v846_v24 = vpop.permute.xlu2 %845 }
 0x216   : > { %v923_v3 = vmul.f32 %v846_v24, %v2127_v1 }
 0x218   : > { %v1035_v14 = vadd.f32 %v2106_v49, %v923_v3 }
 0x21a   : > { %v1051_v26 = vpack.c.bf16 %v1035_v14, %v1035_v14 }
 0x21c   : > { %1068 = vst.msk [vmem:[#allocation2] sm:$0xf] %vm1067_vm1, %v1051_v26 }
 0x226   : > { %v891_v16 = vpop.permute.xlu2 %890 }
 0x227   : > { %v932_v4 = vmul.f32 %v891_v16, %v2147_v22 }
 0x229   : > { %v1044_v18 = vadd.f32 %v2124_v61, %v932_v4 }
 0x22b   : > { %v1060_v11 = vpack.c.bf16 %v1044_v18, %v1044_v18 }
 0x22d   : > { %1077 = vst.msk [vmem:[#allocation2 + $0x24] sm:$0xf] %vm1067_vm1, %v1060_v11 }
 0x233   : > { %v886_v6 = vpop.permute.xlu0 %885 }
 0x234   : > { %v931_v21 = vmul.f32 %v886_v6, %v2135_v9 }
 0x236   : > { %v861_v23 = vpop.permute.xlu2 %860  ;;  %v1043_v1 = vadd.f32 %v2116_v56, %v931_v21 }
 0x237   : > { %v926_v49 = vmul.f32 %v861_v23, %v2168_v40 }
 0x238   : > { %v1059_v30 = vpack.c.bf16 %v1043_v1, %v1043_v1 }
 0x239   : > { %v1038_v27 = vadd.f32 %v2112_v53, %v926_v49 }
 0x23a   : > { %1076 = vst.msk [vmem:[#allocation2 + $0x20] sm:$0xf] %vm1067_vm1, %v1059_v30 }
 0x23b   : > { %v1054_v28 = vpack.c.bf16 %v1038_v27, %v1038_v27  ;;  %v851_v22 = vpop.permute.xlu0 %850 }
 0x23c   : > { %v924_v61 = vmul.f32 %v851_v22, %v2138_v13 }
 0x23d   : > { %1071 = vst.msk [vmem:[#allocation2 + $0xc] sm:$0xf] %vm1067_vm1, %v1054_v28  ;;  %v856_v35 = vpop.permute.xlu1 %855 }
 0x23e   : > { %v866_v8 = vpop.permute.xlu2 %865  ;;  %v925_v9 = vmul.f32 %v856_v35, %v2150_v55  ;;  %v1036_v25 = vadd.f32 %v2102_v46, %v924_v61 }
 0x23f   : > { %v927_v56 = vmul.f32 %v866_v8, %v2180_v10 }
 0x240   : > { %v1037_v40 = vadd.f32 %v2104_v47, %v925_v9  ;;  %v1052_v33 = vpack.c.bf16 %v1036_v25, %v1036_v25 }
 0x241   : > { %v1039_v53 = vadd.f32 %v2108_v50, %v927_v56 }
 0x242   : > { %v1053_v48 = vpack.c.bf16 %v1037_v40, %v1037_v40  ;;  %1069 = vst.msk [vmem:[#allocation2 + $0x4] sm:$0xf] %vm1067_vm1, %v1052_v33 }
 0x243   : > { %v1055_v44 = vpack.c.bf16 %v1039_v53, %v1039_v53 }
 0x244   : > { %1070 = vst.msk [vmem:[#allocation2 + $0x8] sm:$0xf] %vm1067_vm1, %v1053_v48 }
 0x245   : > { %1072 = vst.msk [vmem:[#allocation2 + $0x10] sm:$0xf] %vm1067_vm1, %v1055_v44  ;;  %v896_v13 = vpop.permute.xlu1 %895 }
 0x246   : > { %v906_v38 = vpop.permute.xlu2 %905  ;;  %v933_v55 = vmul.f32 %v896_v13, %v2159_v60 }
 0x247   : > { %v935_v46 = vmul.f32 %v906_v38, %v2177_v2 }
 0x248   : > { %v1045_v10 = vadd.f32 %v2120_v58, %v933_v55 }
 0x249   : > { %v1047_v47 = vadd.f32 %v2132_v7, %v935_v46 }
 0x24a   : > { %v1061_v62 = vpack.c.bf16 %v1045_v10, %v1045_v10 }
 0x24b   : > { %v1063_v50 = vpack.c.bf16 %v1047_v47, %v1047_v47  ;;  %v901_v43 = vpop.permute.xlu0 %900 }
 0x24c   : > { %1078 = vst.msk [vmem:[#allocation2 + $0x28] sm:$0xf] %vm1067_vm1, %v1061_v62  ;;  %v934_v41 = vmul.f32 %v901_v43, %v2165_v37 }
 0x24d   : > { %1080 = vst.msk [vmem:[#allocation2 + $0x30] sm:$0xf] %vm1067_vm1, %v1063_v50 }
 0x24e   : > { %v876_v45 = vpop.permute.xlu2 %875  ;;  %v1046_v34 = vadd.f32 %v2122_v59, %v934_v41 }
 0x24f   : > { %v929_v60 = vmul.f32 %v876_v45, %v2195_v20 }
 0x250   : > { %v1062_v52 = vpack.c.bf16 %v1046_v34, %v1046_v34 }
 0x251   : > { %v1041_v2 = vadd.f32 %v2118_v57, %v929_v60 }
 0x252   : > { %1079 = vst.msk [vmem:[#allocation2 + $0x2c] sm:$0xf] %vm1067_vm1, %v1062_v52 }
 0x253   : > { %v1057_v58 = vpack.c.bf16 %v1041_v2, %v1041_v2 }
 0x255   : > { %1074 = vst.msk [vmem:[#allocation2 + $0x18] sm:$0xf] %vm1067_vm1, %v1057_v58 }
 0x256   : > { %v921_v7 = vpop.permute.xlu2 %920 }
 0x25c   : > { %v871_v19 = vpop.permute.xlu1 %870 }
 0x25d   : > { %v928_v0 = vmul.f32 %v871_v19, %v2192_v17 }
 0x25e   : > { %v1028_v42 = vpop.permute.xlu2 %1027 }
 0x25f   : > { %v1040_v31 = vadd.f32 %v2110_v51, %v928_v0 }
 0x261   : > { %v1056_v37 = vpack.c.bf16 %v1040_v31, %v1040_v31 }
 0x263   : > { %1073 = vst.msk [vmem:[#allocation2 + $0x14] sm:$0xf] %vm1067_vm1, %v1056_v37  ;;  %v916_v59 = vpop.permute.xlu0 %915 }
 0x264   : > { %v937_v20 = vmul.f32 %v916_v59, %v2207_v29  ;;  %v911_v5 = vpop.permute.xlu1 %910  ;;  %v938_v29 = vmul.f32 %v921_v7, %v2219_v36 }
 0x265   : > { %v936_v32 = vmul.f32 %v911_v5, %v2189_v15 }
 0x266   : > { %v1049_v57 = vadd.f32 %v1028_v42, %v937_v20 }
 0x268   : > { %v1065_v12 = vpack.c.bf16 %v1049_v57, %v1049_v57 }
 0x26a   : > { %1082 = vst.msk [vmem:[#allocation2 + $0x38] sm:$0xf] %vm1067_vm1, %v1065_v12 }
 0x26b   : > { %v1023_v39 = vpop.permute.xlu0 %1022 }
 0x26c   : > { %v1048_v24 = vadd.f32 %v1023_v39, %v936_v32  ;;  %v881_v3 = vpop.permute.xlu1 %880 }
 0x26d   : > { %v930_v17 = vmul.f32 %v881_v3, %v2210_v63 }
 0x26e   : > { %v1064_v51 = vpack.c.bf16 %v1048_v24, %v1048_v24 }
 0x26f   : > { %v1042_v14 = vadd.f32 %v2114_v54, %v930_v17 }
 0x270   : > { %1081 = vst.msk [vmem:[#allocation2 + $0x34] sm:$0xf] %vm1067_vm1, %v1064_v51 }
 0x271   : > { %v1058_v26 = vpack.c.bf16 %v1042_v14, %v1042_v14 }
 0x273   : > { %1075 = vst.msk [vmem:[#allocation2 + $0x1c] sm:$0xf] %vm1067_vm1, %v1058_v26 }
 0x274   : > { %v1033_v16 = vpop.permute.xlu1 %1032 }
 0x275   : > { %v1050_v4 = vadd.f32 %v1033_v16, %v938_v29 }
 0x277   : > { %v1066_v18 = vpack.c.bf16 %v1050_v4, %v1050_v4 }
 0x279   : > { %1083 = vst.msk [vmem:[#allocation2 + $0x3c] sm:$0xf] %vm1067_vm1, %v1066_v18 }
 0x27a PF: > { %v1664_v63 = vld [vmem:[#allocation2 + $0x30] sm:$0xff]  ;;  %v1663_v54 = vld [vmem:[#allocation2 + $0x28] sm:$0xff]  ;;  %v1662_v36 = vld [vmem:[#allocation2 + $0x20] sm:$0xff]  ;;  %vm1365_vm2 = vcmask 400384  }
 0x27b   : > { %v1661_v11 = vld [vmem:[#allocation2 + $0x18] sm:$0xff]  ;;  %v1660_v6 = vld [vmem:[#allocation2 + $0x10] sm:$0xff]  ;;  %v1659_v21 = vld [vmem:[#allocation2 + $0x8] sm:$0xff] }
 0x27c   : > { %v1658_v23 = vld [vmem:[#allocation2] sm:$0xff]  ;;  %v1643_v28 = vld [vmem:[%s1800_s25 + $0x8] sm:$0xff]  ;;  %v1644_v8 = vld [vmem:[%s1800_s25 + $0x10] sm:$0xff] }
 0x27d   : > { %v1642_v1 = vld [vmem:[%s1800_s25] sm:$0xff]  ;;  %v1647_v22 = vld [vmem:[%s1800_s25 + $0x28] sm:$0xff]  ;;  %v1648_v9 = vld [vmem:[%s1800_s25 + $0x30] sm:$0xff] }
 0x27e   : > { %v1646_v49 = vld [vmem:[%s1800_s25 + $0x20] sm:$0xff]  ;;  %v1651_v61 = vld [vmem:[%s1800_s25 + $0x48] sm:$0xff]  ;;  %v1652_v25 = vld [vmem:[%s1800_s25 + $0x50] sm:$0xff] }
 0x27f   : > { %v1650_v30 = vld [vmem:[%s1800_s25 + $0x40] sm:$0xff]  ;;  %v1655_v35 = vld [vmem:[%s1800_s25 + $0x68] sm:$0xff]  ;;  %v1656_v56 = vld [vmem:[%s1800_s25 + $0x70] sm:$0xff] }
 0x280   : > { %v1665_v15 = vld [vmem:[#allocation2 + $0x38] sm:$0xff]  ;;  %v1654_v27 = vld [vmem:[%s1800_s25 + $0x60] sm:$0xff] }
 0x281   : > { %1276 = vmatpush.bf16.msra.mxu0 %v1665_v15  ;;  %1682 = vmatpush.bf16.msra.mxu1 %v1665_v15  ;;  %v1645_v40 = vld [vmem:[%s1800_s25 + $0x18] sm:$0xff] }
 0x282   : > { %1683 = vmatpush.bf16.msra.mxu2 %v1665_v15  ;;  %1684 = vmatpush.bf16.msra.mxu3 %v1665_v15  ;;  %v1649_v33 = vld [vmem:[%s1800_s25 + $0x38] sm:$0xff] }
 0x283   : > { %v1653_v53 = vld [vmem:[%s1800_s25 + $0x58] sm:$0xff] }
 0x284   : > { %v1657_v48 = vld [vmem:[%s1800_s25 + $0x78] sm:$0xff] }
 0x285   : > { %1277 = vmatpush.bf16.msra.mxu0 %v1664_v63  ;;  %1685 = vmatpush.bf16.msra.mxu1 %v1664_v63 }
 0x286   : > { %1686 = vmatpush.bf16.msra.mxu2 %v1664_v63  ;;  %1687 = vmatpush.bf16.msra.mxu3 %v1664_v63 }
 0x289   : > { %1278 = vmatpush.bf16.msra.mxu0 %v1663_v54  ;;  %1688 = vmatpush.bf16.msra.mxu1 %v1663_v54 }
 0x28a   : > { %1689 = vmatpush.bf16.msra.mxu2 %v1663_v54  ;;  %1690 = vmatpush.bf16.msra.mxu3 %v1663_v54 }
 0x28d   : > { %1279 = vmatpush.bf16.msra.mxu0 %v1662_v36  ;;  %1691 = vmatpush.bf16.msra.mxu1 %v1662_v36 }
 0x28e   : > { %1692 = vmatpush.bf16.msra.mxu2 %v1662_v36  ;;  %1693 = vmatpush.bf16.msra.mxu3 %v1662_v36 }
 0x291   : > { %1280 = vmatpush.bf16.msra.mxu0 %v1661_v11  ;;  %1694 = vmatpush.bf16.msra.mxu1 %v1661_v11 }
 0x292   : > { %1695 = vmatpush.bf16.msra.mxu2 %v1661_v11  ;;  %1696 = vmatpush.bf16.msra.mxu3 %v1661_v11 }
 0x295   : > { %1281 = vmatpush.bf16.msra.mxu0 %v1660_v6  ;;  %1697 = vmatpush.bf16.msra.mxu1 %v1660_v6 }
 0x296   : > { %1698 = vmatpush.bf16.msra.mxu2 %v1660_v6  ;;  %1699 = vmatpush.bf16.msra.mxu3 %v1660_v6 }
 0x299   : > { %1282 = vmatpush.bf16.msra.mxu0 %v1659_v21  ;;  %1700 = vmatpush.bf16.msra.mxu1 %v1659_v21 }
 0x29a   : > { %1701 = vmatpush.bf16.msra.mxu2 %v1659_v21  ;;  %1702 = vmatpush.bf16.msra.mxu3 %v1659_v21 }
 0x29d   : > { %1283 = vmatpush.bf16.msra.mxu0 %v1658_v23  ;;  %1703 = vmatpush.bf16.msra.mxu1 %v1658_v23 }
 0x29e   : > { %1704 = vmatpush.bf16.msra.mxu2 %v1658_v23  ;;  %1705 = vmatpush.bf16.msra.mxu3 %v1658_v23 }
 0x2a0   : > { %1284 = vmatmul.bf16.vlgmr.msra.gmra.mxu0 %v1642_v1  ;;  %1304 = vmatmul.bf16.vlgmr.msra.gmra.mxu1 %v1646_v49 }
 0x2a1   : > { %1324 = vmatmul.bf16.vlgmr.msra.gmra.mxu2 %v1650_v30  ;;  %1344 = vmatmul.bf16.vlgmr.msra.gmra.mxu3 %v1654_v27 }
 0x2b0   : > { %1289 = vmatmul.bf16.gmra.mxu0 %v1643_v28  ;;  %1309 = vmatmul.bf16.gmra.mxu1 %v1647_v22 }
 0x2b1   : > { %1329 = vmatmul.bf16.gmra.mxu2 %v1651_v61  ;;  %1349 = vmatmul.bf16.gmra.mxu3 %v1655_v35 }
 0x2c0   : > { %1294 = vmatmul.bf16.gmra.mxu0 %v1644_v8  ;;  %1314 = vmatmul.bf16.gmra.mxu1 %v1648_v9 }
 0x2c1   : > { %1334 = vmatmul.bf16.gmra.mxu2 %v1652_v25  ;;  %1354 = vmatmul.bf16.gmra.mxu3 %v1656_v56 }
 0x2d0   : > { %1299 = vmatmul.bf16.gmra.mxu0 %v1645_v40  ;;  %1319 = vmatmul.bf16.gmra.mxu1 %v1649_v33 }
 0x2d1   : > { %1339 = vmatmul.bf16.gmra.mxu2 %v1653_v53  ;;  %1359 = vmatmul.bf16.gmra.mxu3 %v1657_v48 }
 0x31d   : > { %v1285_v44 = vpop.f32.mrf.mxu0  ;;  %v1305_v13 = vpop.f32.mrf.mxu1 }
 0x31e   : > { %1366 = vst.msk [vmem:[%s1805_s28] sm:$0xff] %vm1365_vm2, %v1285_v44 }
 0x31f   : > { %1374 = vst.msk [vmem:[%s1805_s28 + $0x40] sm:$0xff] %vm1365_vm2, %v1305_v13 }
 0x324   : > { %v1325_v38 = vpop.f32.mrf.mxu2  ;;  %v1345_v55 = vpop.f32.mrf.mxu3 }
 0x325   : > { %1382 = vst.msk [vmem:[%s1805_s28 + $0x80] sm:$0xff] %vm1365_vm2, %v1325_v38  ;;  %v1287_v46 = vpop.f32.mrf.mxu0  ;;  %v1307_v10 = vpop.f32.mrf.mxu1 }
 0x326   : > { %1390 = vst.msk [vmem:[%s1805_s28 + $0xc0] sm:$0xff] %vm1365_vm2, %v1345_v55 }
 0x327   : > { %1367 = vst.msk [vmem:[%s1805_s28 + $0x8] sm:$0xff] %vm1365_vm2, %v1287_v46 }
 0x328   : > { %1375 = vst.msk [vmem:[%s1805_s28 + $0x48] sm:$0xff] %vm1365_vm2, %v1307_v10 }
 0x32c   : > { %v1327_v47 = vpop.f32.mrf.mxu2  ;;  %v1347_v62 = vpop.f32.mrf.mxu3 }
 0x32d   : > { %1383 = vst.msk [vmem:[%s1805_s28 + $0x88] sm:$0xff] %vm1365_vm2, %v1327_v47  ;;  %v1290_v50 = vpop.f32.mrf.mxu0  ;;  %v1310_v43 = vpop.f32.mrf.mxu1 }
 0x32e   : > { %1391 = vst.msk [vmem:[%s1805_s28 + $0xc8] sm:$0xff] %vm1365_vm2, %v1347_v62 }
 0x32f   : > { %1368 = vst.msk [vmem:[%s1805_s28 + $0x10] sm:$0xff] %vm1365_vm2, %v1290_v50 }
 0x330   : > { %1376 = vst.msk [vmem:[%s1805_s28 + $0x50] sm:$0xff] %vm1365_vm2, %v1310_v43 }
 0x334   : > { %v1330_v41 = vpop.f32.mrf.mxu2  ;;  %v1350_v45 = vpop.f32.mrf.mxu3 }
 0x335   : > { %1384 = vst.msk [vmem:[%s1805_s28 + $0x90] sm:$0xff] %vm1365_vm2, %v1330_v41  ;;  %v1292_v34 = vpop.f32.mrf.mxu0  ;;  %v1312_v60 = vpop.f32.mrf.mxu1 }
 0x336   : > { %1392 = vst.msk [vmem:[%s1805_s28 + $0xd0] sm:$0xff] %vm1365_vm2, %v1350_v45 }
 0x337   : > { %1369 = vst.msk [vmem:[%s1805_s28 + $0x18] sm:$0xff] %vm1365_vm2, %v1292_v34 }
 0x338   : > { %1377 = vst.msk [vmem:[%s1805_s28 + $0x58] sm:$0xff] %vm1365_vm2, %v1312_v60 }
 0x33c   : > { %v1332_v52 = vpop.f32.mrf.mxu2  ;;  %v1352_v2 = vpop.f32.mrf.mxu3 }
 0x33d   : > { %1385 = vst.msk [vmem:[%s1805_s28 + $0x98] sm:$0xff] %vm1365_vm2, %v1332_v52  ;;  %v1295_v58 = vpop.f32.mrf.mxu0  ;;  %v1315_v7 = vpop.f32.mrf.mxu1 }
 0x33e   : > { %1393 = vst.msk [vmem:[%s1805_s28 + $0xd8] sm:$0xff] %vm1365_vm2, %v1352_v2 }
 0x33f   : > { %1370 = vst.msk [vmem:[%s1805_s28 + $0x20] sm:$0xff] %vm1365_vm2, %v1295_v58 }
 0x340   : > { %1378 = vst.msk [vmem:[%s1805_s28 + $0x60] sm:$0xff] %vm1365_vm2, %v1315_v7 }
 0x344   : > { %v1335_v19 = vpop.f32.mrf.mxu2  ;;  %v1355_v0 = vpop.f32.mrf.mxu3 }
 0x345   : > { %1386 = vst.msk [vmem:[%s1805_s28 + $0xa0] sm:$0xff] %vm1365_vm2, %v1335_v19  ;;  %v1297_v31 = vpop.f32.mrf.mxu0  ;;  %v1317_v37 = vpop.f32.mrf.mxu1 }
 0x346   : > { %1394 = vst.msk [vmem:[%s1805_s28 + $0xe0] sm:$0xff] %vm1365_vm2, %v1355_v0 }
 0x347   : > { %1371 = vst.msk [vmem:[%s1805_s28 + $0x28] sm:$0xff] %vm1365_vm2, %v1297_v31 }
 0x348   : > { %1379 = vst.msk [vmem:[%s1805_s28 + $0x68] sm:$0xff] %vm1365_vm2, %v1317_v37 }
 0x34c   : > { %v1337_v59 = vpop.f32.mrf.mxu2  ;;  %v1357_v20 = vpop.f32.mrf.mxu3 }
 0x34d   : > { %1387 = vst.msk [vmem:[%s1805_s28 + $0xa8] sm:$0xff] %vm1365_vm2, %v1337_v59  ;;  %v1300_v5 = vpop.f32.mrf.mxu0  ;;  %v1320_v42 = vpop.f32.mrf.mxu1 }
 0x34e   : > { %1395 = vst.msk [vmem:[%s1805_s28 + $0xe8] sm:$0xff] %vm1365_vm2, %v1357_v20 }
 0x34f   : > { %1372 = vst.msk [vmem:[%s1805_s28 + $0x30] sm:$0xff] %vm1365_vm2, %v1300_v5 }
 0x350   : > { %1380 = vst.msk [vmem:[%s1805_s28 + $0x70] sm:$0xff] %vm1365_vm2, %v1320_v42 }
 0x354   : > { %v1340_v57 = vpop.f32.mrf.mxu2  ;;  %v1360_v12 = vpop.f32.mrf.mxu3 }
 0x355   : > { %1388 = vst.msk [vmem:[%s1805_s28 + $0xb0] sm:$0xff] %vm1365_vm2, %v1340_v57  ;;  %v1302_v32 = vpop.f32.mrf.mxu0  ;;  %v1322_v39 = vpop.f32.mrf.mxu1 }
 0x356   : > { %1396 = vst.msk [vmem:[%s1805_s28 + $0xf0] sm:$0xff] %vm1365_vm2, %v1360_v12 }
 0x357   : > { %1373 = vst.msk [vmem:[%s1805_s28 + $0x38] sm:$0xff] %vm1365_vm2, %v1302_v32 }
 0x358   : > { %1381 = vst.msk [vmem:[%s1805_s28 + $0x78] sm:$0xff] %vm1365_vm2, %v1322_v39 }
 0x35c   : > { %v1342_v24 = vpop.f32.mrf.mxu2  ;;  %v1362_v3 = vpop.f32.mrf.mxu3 }
 0x35d   : > { %1389 = vst.msk [vmem:[%s1805_s28 + $0xb8] sm:$0xff] %vm1365_vm2, %v1342_v24 }
 0x35e   : > { %1397 = vst.msk [vmem:[%s1805_s28 + $0xf8] sm:$0xff] %vm1365_vm2, %v1362_v3 }
 0x35f PF: > { %s15_s18 = sadd.s32 1, %s1756_s18  }
 0x360   : > { %p12_p5 = scmp.ge.s32.totalorder %s15_s18, 4  }
 0x362   :  { %14 = sbr.rel (!%p12_p5) target bundleno = 1 (0x1), region = 74 }

</bundles_post_ra>
